<compile_context>
chip_gen: v6e
topology: v6e:2x2x1
jax: 0.10.0
libtpu: 0.0.40
codegen_flags: <defaults>
</compile_context>

<pallas_src>
import jax
import jax.numpy as jnp
from jax.experimental import pallas as pl
from jax.experimental.pallas import tpu as pltpu


def _round_up(a, b):
    return (a + b - 1) // b * b


def _pick_tile(total, target):
    """Largest multiple of 128 that divides `total` (itself a 128-multiple), <= target."""
    t = min(target, total)
    t -= t % 128
    while t > 128 and total % t != 0:
        t -= 128
    return max(t, 128)


def _vmem_limit(est_bytes):
    # Headroom over the estimated working set, but stay below v7x's 64 MiB VMEM.
    return int(min(48 * 1024 * 1024, max(32 * 1024 * 1024, est_bytes * 3 // 2)))


# ----------------------------------------------------------------------------
# Kernels
# ----------------------------------------------------------------------------

def _equal_linear_resident_kernel(x_ref, w_ref, b_ref, o_ref):
    """Whole reduction (K) resident: one MXU matmul + bias add per output tile."""
    acc = jnp.dot(x_ref[...], w_ref[...], preferred_element_type=jnp.float32)
    o_ref[...] = (acc + b_ref[...]).astype(o_ref.dtype)


def _equal_linear_tiled_kernel(x_ref, w_ref, b_ref, o_ref, acc_ref):
    """General path: grid axis 2 is the K reduction, f32 VMEM accumulator."""
    k = pl.program_id(2)

    @pl.when(k == 0)
    def _():
        acc_ref[...] = jnp.zeros_like(acc_ref)

    acc_ref[...] += jnp.dot(
        x_ref[...], w_ref[...], preferred_element_type=jnp.float32)

    @pl.when(k == pl.num_programs(2) - 1)
    def _():
        o_ref[...] = (acc_ref[...] + b_ref[...]).astype(o_ref.dtype)


# ----------------------------------------------------------------------------
# Wrappers
# ----------------------------------------------------------------------------

def prepare_equal_linear_params(weight, bias, lr_mul, *, compute_dtype=jnp.bfloat16):
    """One-time prep: (weight*lr_mul)^T padded to 128-multiples, bias*lr_mul (f32)."""
    out_dim, in_dim = weight.shape
    k_pad = _round_up(in_dim, 128)
    n_pad = _round_up(out_dim, 128)
    wt = jnp.pad((weight * lr_mul).T.astype(compute_dtype),
                 ((0, k_pad - in_dim), (0, n_pad - out_dim)))
    if bias is None:
        brow = jnp.zeros((1, n_pad), jnp.float32)
    else:
        brow = jnp.pad((bias * lr_mul).astype(jnp.float32).reshape(1, out_dim),
                       ((0, 0), (0, n_pad - out_dim)))
    return wt, brow


def _equal_linear_prepared(x, wt, bias_row, out_dim, *,
                           compute_dtype=jnp.bfloat16,
                           resident_weight_bytes=8 * 1024 * 1024):
    """Forward with pre-padded, pre-scaled weight (K_pad, N_pad) and bias (1, N_pad)."""
    k_pad, n_pad = wt.shape
    lead_shape = x.shape[:-1]
    in_dim = x.shape[-1]
    assert in_dim <= k_pad
    out_dtype = x.dtype

    x2 = x.reshape(-1, in_dim)
    m = x2.shape[0]
    sub = 16 if compute_dtype == jnp.bfloat16 else 8

    w_bytes = wt.size * wt.dtype.itemsize
    out_isize = jnp.dtype(out_dtype).itemsize
    x_isize = jnp.dtype(compute_dtype).itemsize

    if w_bytes <= resident_weight_bytes:
        # ---- Weight-resident path: no K grid axis, no accumulator. ----
        tm = 512 if m >= 512 else _round_up(max(m, 1), sub)
        m_pad = _round_up(m, tm)
        gm = m_pad // tm
        # Give a v7x megacore >= 2 parallel tiles when M alone yields one step.
        tn = n_pad // 2 if (gm == 1 and n_pad % 256 == 0) else n_pad
        gn = n_pad // tn
        tk = k_pad

        xp = jnp.pad(x2.astype(compute_dtype),
                     ((0, m_pad - m), (0, k_pad - in_dim)))

        flops = 2 * m_pad * n_pad * k_pad
        bytes_accessed = (xp.size * x_isize + w_bytes + bias_row.size * 4
                          + m_pad * n_pad * out_isize)
        vmem_est = (2 * tm * tk * x_isize + 2 * tk * tn * wt.dtype.itemsize
                    + 2 * tm * tn * out_isize + 2 * tn * 4)

        out_padded = pl.pallas_call(
            _equal_linear_resident_kernel,
            out_shape=jax.ShapeDtypeStruct((m_pad, n_pad), out_dtype),
            grid_spec=pltpu.PrefetchScalarGridSpec(
                num_scalar_prefetch=0,
                grid=(gm, gn),
                in_specs=[
                    pl.BlockSpec((tm, tk), lambda i, j: (i, 0)),   # x
                    pl.BlockSpec((tk, tn), lambda i, j: (0, j)),   # W^T (resident)
                    pl.BlockSpec((1, tn), lambda i, j: (0, j)),    # bias*lr_mul
                ],
                out_specs=pl.BlockSpec((tm, tn), lambda i, j: (i, j)),
            ),
            compiler_params=pltpu.CompilerParams(
                dimension_semantics=("parallel", "parallel"),
                vmem_limit_bytes=_vmem_limit(vmem_est)),
            cost_estimate=pl.CostEstimate(
                flops=flops, transcendentals=0, bytes_accessed=bytes_accessed),
        )(xp, wt, bias_row)
    else:
        # ---- General tiled path: large output tiles, K reduction last. ----
        tm = 512 if m >= 512 else _round_up(max(m, 1), sub)
        m_pad = _round_up(m, tm)
        tn = _pick_tile(n_pad, 512)
        tk = _pick_tile(k_pad, 1024)
        gm, gn, gk = m_pad // tm, n_pad // tn, k_pad // tk

        xp = jnp.pad(x2.astype(compute_dtype),
                     ((0, m_pad - m), (0, k_pad - in_dim)))

        flops = 2 * m_pad * n_pad * k_pad
        bytes_accessed = (xp.size * x_isize * gn        # x re-streamed per N tile
                          + w_bytes * gm                # W re-streamed per M tile
                          + bias_row.size * 4 * gm
                          + m_pad * n_pad * out_isize)
        vmem_est = (2 * tm * tk * x_isize + 2 * tk * tn * wt.dtype.itemsize
                    + 2 * tm * tn * out_isize + tm * tn * 4 + 2 * tn * 4)

        out_padded = pl.pallas_call(
            _equal_linear_tiled_kernel,
            out_shape=jax.ShapeDtypeStruct((m_pad, n_pad), out_dtype),
            grid_spec=pltpu.PrefetchScalarGridSpec(
                num_scalar_prefetch=0,
                grid=(gm, gn, gk),
                in_specs=[
                    pl.BlockSpec((tm, tk), lambda i, j, k: (i, k)),   # x
                    pl.BlockSpec((tk, tn), lambda i, j, k: (k, j)),   # W^T
                    pl.BlockSpec((1, tn), lambda i, j, k: (0, j)),    # bias*lr_mul
                ],
                out_specs=pl.BlockSpec((tm, tn), lambda i, j, k: (i, j)),
                scratch_shapes=[pltpu.VMEM((tm, tn), jnp.float32)],
            ),
            compiler_params=pltpu.CompilerParams(
                dimension_semantics=("parallel", "parallel", "arbitrary"),
                vmem_limit_bytes=_vmem_limit(vmem_est)),
            cost_estimate=pl.CostEstimate(
                flops=flops, transcendentals=0, bytes_accessed=bytes_accessed),
        )(xp, wt, bias_row)

    return out_padded[:m, :out_dim].reshape(lead_shape + (out_dim,))


def equal_linear(x, weight, bias=None, lr_mul=1.0, *, compute_dtype=jnp.bfloat16):
    """One-shot API (weight prep not cached). weight: (out_dim, in_dim)."""
    wt, brow = prepare_equal_linear_params(weight, bias, lr_mul,
                                           compute_dtype=compute_dtype)
    return _equal_linear_prepared(x, wt, brow, weight.shape[0],
                                  compute_dtype=compute_dtype)


class EqualLinear:
    """JAX/Pallas port of stylegan2_pytorch.EqualLinear (forward pass only)."""

    def __init__(self, in_dim, out_dim, lr_mul=1, bias=True, *, key=None,
                 compute_dtype=jnp.bfloat16):
        if key is None:
            key = jax.random.PRNGKey(0)
        # Matches torch init: weight ~ randn(out_dim, in_dim), bias = zeros.
        self.weight = jax.random.normal(key, (out_dim, in_dim), jnp.float32)
        self.bias = jnp.zeros((out_dim,), jnp.float32) if bias else None
        self.lr_mul = lr_mul
        self.out_dim = out_dim
        self.compute_dtype = compute_dtype
        self._refresh_cache()

    def _refresh_cache(self):
        """Re-prepare cached kernel operands after mutating weight/bias/lr_mul."""
        self._wt, self._brow = prepare_equal_linear_params(
            self.weight, self.bias, self.lr_mul, compute_dtype=self.compute_dtype)

    def __call__(self, x):
        return _equal_linear_prepared(x, self._wt, self._brow, self.out_dim,
                                      compute_dtype=self.compute_dtype)

    forward = __call__


if __name__ == "__main__":
    key = jax.random.PRNGKey(0)
    k_x, k_w, k_b = jax.random.split(key, 3)

    batch, seq, in_dim, out_dim = 2, 8, 64, 32
    lr_mul = 0.1

    x = jax.random.normal(k_x, (batch, seq, in_dim), jnp.float32)

    layer = EqualLinear(in_dim, out_dim, lr_mul=lr_mul, key=k_w)
    # Use a nonzero bias so the bias * lr_mul path is actually exercised.
    layer.bias = jax.random.normal(k_b, (out_dim,), jnp.float32)
    layer._refresh_cache()

    out = jax.block_until_ready(layer(x))
    assert out.shape == (batch, seq, out_dim)

    # Reference: F.linear(input, weight * lr_mul, bias * lr_mul) in plain f32 JAX.
    ref = x @ (layer.weight * lr_mul).T + layer.bias * lr_mul
    max_err = float(jnp.max(jnp.abs(out - ref)))
    assert jnp.allclose(out, ref, rtol=5e-2, atol=5e-2), max_err

    print("KERNEL_OK")
</pallas_src>

<mosaic_0001>
module attributes {stable_mosaic.version = 11 : i64} {
  func.func @_equal_linear_resident_kernel(%arg0: i32, %arg1: i32, %arg2: memref<16x128xbf16, #tpu.memory_space<vmem>>, %arg3: memref<128x128xbf16, #tpu.memory_space<vmem>>, %arg4: memref<1x128xf32, #tpu.memory_space<vmem>>, %arg5: memref<16x128xf32, #tpu.memory_space<vmem>>) attributes {dimension_semantics = [#tpu.dimension_semantics<parallel>, #tpu.dimension_semantics<parallel>], iteration_bounds = array<i64: 1, 1>, scalar_prefetch = 0 : i64, scratch_operands = 0 : i64, tpu.core_type = #tpu.core_type<tc>, window_params = [{transform_indices = @transform_0, window_bounds = array<i64: 16, 128>}, {transform_indices = @transform_1, window_bounds = array<i64: 128, 128>}, {transform_indices = @transform_2, window_bounds = array<i64: 1, 128>}, {transform_indices = @transform_3, window_bounds = array<i64: 16, 128>}]} {
    %c0 = arith.constant 0 : index
    %c0_0 = arith.constant 0 : index
    %0 = vector.load %arg2[%c0, %c0_0] : memref<16x128xbf16, #tpu.memory_space<vmem>>, vector<16x128xbf16>
    %c0_1 = arith.constant 0 : index
    %c0_2 = arith.constant 0 : index
    %1 = vector.load %arg3[%c0_1, %c0_2] : memref<128x128xbf16, #tpu.memory_space<vmem>>, vector<128x128xbf16>
    %cst = arith.constant dense<0.000000e+00> : vector<16x128xf32>
    %2 = tpu.matmul %0, %1, %cst {dimension_numbers = #tpu.dot_dimension_numbers<[1], [0], [0], [1], [0, 0, 1, 1], [], []>} : vector<16x128xbf16>, vector<128x128xbf16>, vector<16x128xf32> -> vector<16x128xf32>
    %c0_3 = arith.constant 0 : index
    %c0_4 = arith.constant 0 : index
    %3 = vector.load %arg4[%c0_3, %c0_4] : memref<1x128xf32, #tpu.memory_space<vmem>>, vector<1x128xf32>
    %4 = vector.broadcast %3 : vector<1x128xf32> to vector<16x128xf32>
    %5 = arith.addf %2, %4 : vector<16x128xf32>
    %c0_5 = arith.constant 0 : index
    %c0_6 = arith.constant 0 : index
    %6 = vector.load %arg5[%c0_5, %c0_6] : memref<16x128xf32, #tpu.memory_space<vmem>>, vector<16x128xf32>
    tpu.vector_store %arg5[%c0_5, %c0_6], %5 {strides = array<i32>} : memref<16x128xf32, #tpu.memory_space<vmem>>, vector<16x128xf32>,
    return
  }
  func.func @transform_0(%arg0: i32, %arg1: i32) -> (i32, i32) {
    %c0_i32 = arith.constant 0 : i32
    %c0_i32_0 = arith.constant 0 : i32
    return %arg0, %c0_i32 : i32, i32
  }
  func.func @transform_1(%arg0: i32, %arg1: i32) -> (i32, i32) {
    %c0_i32 = arith.constant 0 : i32
    %c0_i32_0 = arith.constant 0 : i32
    return %c0_i32, %arg1 : i32, i32
  }
  func.func @transform_2(%arg0: i32, %arg1: i32) -> (i32, i32) {
    %c0_i32 = arith.constant 0 : i32
    %c0_i32_0 = arith.constant 0 : i32
    return %c0_i32, %arg1 : i32, i32
  }
  func.func @transform_3(%arg0: i32, %arg1: i32) -> (i32, i32) {
    %c0_i32 = arith.constant 0 : i32
    return %arg0, %arg1 : i32, i32
  }
}

</mosaic_0001>

<bundles_post_ra>
// kernel: tpu_custom_call.1
= control target key start
LH: loop header
LB: loop body
LE: loop exit
PB: predicated region body
PF: predicated region fallthrough
CT: control target
= control target key end

     0   :  { %8 = vsyncpa [#allocation3], 0  ;;  %s348_s0 = inlined_call_operand.hbm [shape: bf16[16,128], index: 0, kind: input, shape index: {}]   ;;  %s349_s1 = inlined_call_operand.hbm [shape: bf16[128,128], index: 1, kind: input, shape index: {}]   ;;  %s350_s2 = inlined_call_operand.vmem [shape: f32[1,128], index: 2, kind: input, shape index: {}]   ;;  %s351_s3 = inlined_call_operand.hbm [shape: f32[16,128], index: 3, kind: output, shape index: {}]  }
   0x1   :  { %9 = vsyncpa [#allocation6], 0 }
   0x2   :  { %10 = vsyncpa [#allocation4], 0  ;;  %s307_s12 = smov [#allocation2]  }
   0x3   :  { %s16_s13 = sshll.u32 %s307_s12, 4  ;;  %s17_s13 = int_to_ptr.vmem [resolvable:$true] %s16_s13 }
   0x4   :  { %s249_s14 = scalar_lea.vmem %s17_s13, 128  ;;  %p254_p1 = scmp.lt.s32.totalorder %s17_s13, %s17_s13 }
   0x5   :  { %p250_p0 = scmp.ne.s32.totalorder %s17_s13, %s249_s14  ;;  %p255_p2 = scmp.lt.s32.totalorder %s249_s14, %s249_s14 }
   0x7   :  { %p256_p3 = por %p255_p2, %p254_p1 }
   0x9   :  { %p257_p4 = pnand %p256_p3, %p250_p0 }
   0xb   :  { %260 = shalt.err (!%p257_p4)
}
   0xc   :  { %s308_s15 = smov 64   ;;  %s309_s16 = smov 4  }
   0xd   :  { %22 = dma.hbm_to_vmem [thread:$0]  %s348_s0, 128, %s17_s13, [#allocation3], %s308_s15, %s308_s15, %s309_s16  }
   0xe   :  { %s310_s19 = smov [#allocation5]  }
   0xf   :  { %s28_s20 = sshll.u32 %s310_s19, 4  ;;  %s29_s20 = int_to_ptr.vmem [resolvable:$true] %s28_s20 }
  0x10   :  { %s269_s21 = scalar_lea.vmem %s29_s20, 1024  ;;  %p274_p6 = scmp.lt.s32.totalorder %s29_s20, %s29_s20 }
  0x11   :  { %p270_p5 = scmp.ne.s32.totalorder %s29_s20, %s269_s21  ;;  %p275_p7 = scmp.lt.s32.totalorder %s269_s21, %s269_s21 }
  0x13   :  { %p276_p8 = por %p275_p7, %p274_p6 }
  0x15   :  { %p277_p9 = pnand %p276_p8, %p270_p5 }
  0x17   :  { %280 = shalt.err (!%p277_p9)
}
  0x18   :  { %34 = dma.hbm_to_vmem [thread:$0]  %s349_s1, 1024, %s29_s20, [#allocation6], %s308_s15, %s308_s15, %s309_s16  }
  0x19   :  { %301 = dma.done.wait [#allocation3], 128  }
  0x1a   :  { %302 = vsyncadd [#allocation3], 4294967168 }
  0x1b   :  { %303 = dma.done.wait [#allocation6], 1024  }
  0x1c   :  { %304 = vsyncadd [#allocation6], 4294966272  ;;  %v311_v0 = vmov 0.0   ;;  %vm312_vm0 = vmmov 0   ;;  %v232_v1 = vld [vmem:[#allocation5 + $0x38] sm:$0xff]   ;;  %v233_v2 = vld [vmem:[#allocation5 + $0x30] sm:$0xff]  }
  0x1d   :  { %203 = vmatprep.subr.bf16.mxu0 %v311_v0  ;;  %219 = vmatprep.mubr.msk.bf16.mxu0 %vm312_vm0, %v311_v0  ;;  %v234_v3 = vld [vmem:[#allocation5 + $0x28] sm:$0xff]   ;;  %v235_v4 = vld [vmem:[#allocation5 + $0x20] sm:$0xff]   ;;  %v236_v5 = vld [vmem:[#allocation5 + $0x18] sm:$0xff]   ;;  %s313_s24 = smov [#allocation7]  }
  0x1e   :  { %204 = vmatpush3.bf16.msra.mxu0 %v232_v1  ;;  %v237_v6 = vld [vmem:[#allocation5 + $0x10] sm:$0xff]   ;;  %v238_v7 = vld [vmem:[#allocation5 + $0x8] sm:$0xff]   ;;  %v239_v8 = vld [vmem:[#allocation5] sm:$0xff]   ;;  %s171_s25 = sshll.u32 %s313_s24, 4  ;;  %s172_s25 = int_to_ptr.vmem [resolvable:$true] %s171_s25 }
  0x1f   :  { %205 = vmatprep.subr.bf16.mxu0 %v311_v0  ;;  %v240_v9 = vld [vmem:[#allocation2] sm:$0xff]   ;;  %s281_s26 = scalar_lea.vmem %s172_s25, 256  ;;  %p286_p11 = scmp.lt.s32.totalorder %s172_s25, %s172_s25 }
  0x20   :  { %v184_v10 = vld [vmem:[%s350_s2] ss:$0 sm:$0xff]  ;;  %p282_p10 = scmp.ne.s32.totalorder %s172_s25, %s281_s26  ;;  %p287_p12 = scmp.lt.s32.totalorder %s281_s26, %s281_s26 }
  0x22   :  { %206 = vmatpush3.bf16.msra.mxu0 %v233_v2  ;;  %p288_p13 = por %p287_p12, %p286_p11 }
  0x23   :  { %207 = vmatprep.subr.bf16.mxu0 %v311_v0 }
  0x24   :  { %p289_p0 = pnand %p288_p13, %p282_p10 }
  0x26   :  { %208 = vmatpush3.bf16.msra.mxu0 %v234_v3 }
  0x27   :  { %209 = vmatprep.subr.bf16.mxu0 %v311_v0 }
  0x2a   :  { %210 = vmatpush3.bf16.msra.mxu0 %v235_v4 }
  0x2b   :  { %211 = vmatprep.subr.bf16.mxu0 %v311_v0 }
  0x2e   :  { %212 = vmatpush3.bf16.msra.mxu0 %v236_v5 }
  0x2f   :  { %213 = vmatprep.subr.bf16.mxu0 %v311_v0 }
  0x32   :  { %214 = vmatpush3.bf16.msra.mxu0 %v237_v6 }
  0x33   :  { %215 = vmatprep.subr.bf16.mxu0 %v311_v0 }
  0x36   :  { %216 = vmatpush3.bf16.msra.mxu0 %v238_v7 }
  0x37   :  { %217 = vmatprep.subr.bf16.mxu0 %v311_v0 }
  0x3a   :  { %218 = vmatpush3.bf16.msra.mxu0 %v239_v8 }
  0x3d   :  { %220 = vmatmul.mubr.bf16.vlgmr.msra.gmra.mxu0 %v240_v9 }
  0xfd   :  { %v157_v11 = vpop.f32.mrf.mxu0 }
  0xfe   :  { %v158_v12 = vadd.f32 %v184_v10, %v157_v11 }
  0xff   :  { %v221_v13 = vpop.f32.mrf.mxu0 }
 0x100   :  { %164 = vst [vmem:[#allocation7] sm:$0xff] %v158_v12 }
 0x101   :  { %v160_v14 = vpop.f32.mrf.mxu0 }
 0x102   :  { %v161_v15 = vadd.f32 %v184_v10, %v160_v14 }
 0x103   :  { %v222_v16 = vpop.f32.mrf.mxu0 }
 0x104   :  { %165 = vst [vmem:[#allocation7 + $0x8] sm:$0xff] %v161_v15 }
 0x105   :  { %292 = shalt.err (!%p289_p0)
}
 0x106   :  { %s314_s27 = smov 128   ;;  %s315_s2 = smov 8  }
 0x107   :  { %177 = dma.vmem_to_hbm [thread:$0]  %s172_s25, 256, %s351_s3, [#allocation4], %s314_s27, %s314_s27, %s315_s2  }
 0x108   :  { %305 = dma.done.wait [#allocation4], 256  }
 0x109   :  { %306 = vsyncadd [#allocation4], 4294967040 }
 0x10a   :  { %181 = vsyncpa [#allocation3], 1 }
 0x10b   :  { %182 = vsyncpa [#allocation6], 1 }
 0x10c   :  { %183 = vsyncpa [#allocation4], 1 }

</bundles_post_ra>
